<compile_context>
chip_gen: v6e
topology: v6e:2x2x1
jax: 0.10.0
libtpu: 0.0.40
codegen_flags: <defaults>
</compile_context>

<pallas_src>
import jax
import jax.numpy as jnp
from jax.experimental import pallas as pl
from jax.experimental.pallas import tpu as pltpu


def _cdiv(a, b):
    return (a + b - 1) // b


def _round_up(x, m):
    return ((x + m - 1) // m) * m


def _policy_kernel(x_ref, w1_ref, b1_ref, w2_ref, b2_ref, o_ref):
    # ---- fc1 + ReLU (MXU matmul, f32 accumulate; bias/ReLU on VPU in f32) ----
    h = jnp.dot(x_ref[...], w1_ref[...], preferred_element_type=jnp.float32)
    h = jnp.maximum(h + b1_ref[...], 0.0)

    # ---- fc2 ----
    logits = jnp.dot(h.astype(w2_ref.dtype), w2_ref[...],
                     preferred_element_type=jnp.float32)
    logits = logits + b2_ref[...]

    # ---- numerically-stable softmax over last dim (exact normalization) ----
    m = jnp.max(logits, axis=-1, keepdims=True)
    e = jnp.exp(logits - m)
    denom = jnp.sum(e, axis=-1, keepdims=True)
    o_ref[...] = (e / denom).astype(o_ref.dtype)


def prepare_params(w1, b1, w2, b2, matmul_dtype=jnp.bfloat16):
    """One-time (per param update) weight preparation: layout + dtype cast.

    Weights are stored as (in, out); biases as (1, out) f32.
    """
    return (w1.astype(matmul_dtype),
            b1.reshape(1, -1).astype(jnp.float32),
            w2.astype(matmul_dtype),
            b2.reshape(1, -1).astype(jnp.float32))


def policy_net_forward(x, params, *, block_b=4096, min_tiles=2):
    """x: (B, state_dim) f32. Returns softmax probabilities (B, action_dim) f32."""
    w1, b1, w2, b2 = params
    matmul_dtype = w1.dtype
    B, S = x.shape
    S_w, H = w1.shape
    H_w, A = w2.shape
    assert S_w == S and H_w == H

    # Batch tiling: pick TB from the number of tiles (caps batch padding at
    # < TB rows total) and keep >= 2 tiles so both v7x TensorCores get work.
    sub = 16 if matmul_dtype == jnp.bfloat16 else 8   # sublane packing
    num_tiles = max(min_tiles, _cdiv(B, block_b))
    TB = _round_up(_cdiv(B, num_tiles), sub)
    B_p = num_tiles * TB

    x_p = x.astype(matmul_dtype)
    if B_p != B:
        x_p = jnp.pad(x_p, ((0, B_p - B), (0, 0)))

    # VMEM budget: double-buffered x/out tiles + resident weights + f32 temps.
    itemsize = jnp.dtype(matmul_dtype).itemsize
    footprint = (2 * TB * S * itemsize          # x tiles (double-buffered)
                 + 2 * TB * A * 4               # out tiles (double-buffered)
                 + (S * H + H * A) * itemsize   # resident weights
                 + (H + A) * 4                  # resident biases
                 + TB * (H + 2 * A) * 4)        # f32 intermediates h/logits/e
    vmem_limit = min(max(4 * footprint, 16 << 20), 32 << 20)

    out_p = pl.pallas_call(
        _policy_kernel,
        out_shape=jax.ShapeDtypeStruct((B_p, A), jnp.float32),
        grid=(num_tiles,),
        in_specs=[
            pl.BlockSpec((TB, S), lambda i: (i, 0)),   # x tile moves with batch
            pl.BlockSpec((S, H), lambda i: (0, 0)),    # weights stay resident
            pl.BlockSpec((1, H), lambda i: (0, 0)),
            pl.BlockSpec((H, A), lambda i: (0, 0)),
            pl.BlockSpec((1, A), lambda i: (0, 0)),
        ],
        out_specs=pl.BlockSpec((TB, A), lambda i: (i, 0)),
        compiler_params=pltpu.CompilerParams(
            dimension_semantics=("parallel",),   # v7x: shard batch tiles over 2 TCs
            vmem_limit_bytes=vmem_limit,
        ),
    )(x_p, w1, b1, w2, b2)

    return out_p[:B] if B_p != B else out_p


def init_params(key, state_dim, hidden_dim, action_dim):
    """Deterministic synthetic init mirroring torch.nn.Linear's uniform scheme."""
    k1, k2, k3, k4 = jax.random.split(key, 4)
    bound1 = 1.0 / jnp.sqrt(state_dim)
    bound2 = 1.0 / jnp.sqrt(hidden_dim)
    # stored as (in, out) so the kernel computes x @ W + b
    w1 = jax.random.uniform(k1, (state_dim, hidden_dim), jnp.float32, -bound1, bound1)
    b1 = jax.random.uniform(k2, (hidden_dim,), jnp.float32, -bound1, bound1)
    w2 = jax.random.uniform(k3, (hidden_dim, action_dim), jnp.float32, -bound2, bound2)
    b2 = jax.random.uniform(k4, (action_dim,), jnp.float32, -bound2, bound2)
    return w1, b1, w2, b2


if __name__ == "__main__":
    # Small shapes consistent with a PPO policy net (e.g. CartPole-like).
    batch, state_dim, hidden_dim, action_dim = 8, 4, 32, 2

    key = jax.random.PRNGKey(0)
    kx, kp = jax.random.split(key)
    x = jax.random.normal(kx, (batch, state_dim), jnp.float32)
    w1, b1, w2, b2 = init_params(kp, state_dim, hidden_dim, action_dim)

    # reference in plain JAX
    h_ref = jnp.maximum(x @ w1 + b1[None, :], 0.0)
    ref = jax.nn.softmax(h_ref @ w2 + b2[None, :], axis=-1)

    # Default bf16 matmul path (fast path on all generations).
    params_bf16 = prepare_params(w1, b1, w2, b2, matmul_dtype=jnp.bfloat16)
    probs = jax.block_until_ready(policy_net_forward(x, params_bf16))
    assert probs.shape == (batch, action_dim)
    assert jnp.allclose(probs, ref, atol=5e-2)
    assert jnp.allclose(jnp.sum(probs, axis=-1), 1.0, atol=1e-3)

    # f32 matmul path (tight check).
    params_f32 = prepare_params(w1, b1, w2, b2, matmul_dtype=jnp.float32)
    probs_f32 = jax.block_until_ready(policy_net_forward(x, params_f32))
    assert probs_f32.shape == (batch, action_dim)
    assert jnp.allclose(probs_f32, ref, atol=2e-3, rtol=2e-3)
    assert jnp.allclose(jnp.sum(probs_f32, axis=-1), 1.0, atol=1e-3)

    print("KERNEL_OK")
</pallas_src>

<mosaic_0001>
module attributes {stable_mosaic.version = 11 : i64} {
  func.func @_policy_kernel(%arg0: i32, %arg1: memref<16x4xbf16, #tpu.memory_space<vmem>>, %arg2: memref<4x32xbf16, #tpu.memory_space<vmem>>, %arg3: memref<1x32xf32, #tpu.memory_space<vmem>>, %arg4: memref<32x2xbf16, #tpu.memory_space<vmem>>, %arg5: memref<1x2xf32, #tpu.memory_space<vmem>>, %arg6: memref<16x2xf32, #tpu.memory_space<vmem>>) attributes {dimension_semantics = [#tpu.dimension_semantics<parallel>], iteration_bounds = array<i64: 2>, scalar_prefetch = 0 : i64, scratch_operands = 0 : i64, tpu.core_type = #tpu.core_type<tc>, window_params = [{transform_indices = @transform_0, window_bounds = array<i64: 16, 4>}, {pipeline_mode = #tpu.pipeline_mode<synchronous>, transform_indices = @transform_1, window_bounds = array<i64: 4, 32>}, {pipeline_mode = #tpu.pipeline_mode<synchronous>, transform_indices = @transform_2, window_bounds = array<i64: 1, 32>}, {pipeline_mode = #tpu.pipeline_mode<synchronous>, transform_indices = @transform_3, window_bounds = array<i64: 32, 2>}, {pipeline_mode = #tpu.pipeline_mode<synchronous>, transform_indices = @transform_4, window_bounds = array<i64: 1, 2>}, {transform_indices = @transform_5, window_bounds = array<i64: 16, 2>}]} {
    %c0 = arith.constant 0 : index
    %c0_0 = arith.constant 0 : index
    %0 = vector.load %arg1[%c0, %c0_0] : memref<16x4xbf16, #tpu.memory_space<vmem>>, vector<16x4xbf16>
    %c0_1 = arith.constant 0 : index
    %c0_2 = arith.constant 0 : index
    %1 = vector.load %arg2[%c0_1, %c0_2] : memref<4x32xbf16, #tpu.memory_space<vmem>>, vector<4x32xbf16>
    %cst = arith.constant dense<0.000000e+00> : vector<16x32xf32>
    %2 = tpu.matmul %0, %1, %cst {dimension_numbers = #tpu.dot_dimension_numbers<[1], [0], [0], [1], [0, 0, 1, 1], [], []>} : vector<16x4xbf16>, vector<4x32xbf16>, vector<16x32xf32> -> vector<16x32xf32>
    %c0_3 = arith.constant 0 : index
    %c0_4 = arith.constant 0 : index
    %3 = vector.load %arg3[%c0_3, %c0_4] : memref<1x32xf32, #tpu.memory_space<vmem>>, vector<1x32xf32>
    %4 = vector.broadcast %3 : vector<1x32xf32> to vector<16x32xf32>
    %5 = arith.addf %2, %4 : vector<16x32xf32>
    %cst_5 = arith.constant 0.000000e+00 : f32
    %6 = vector.broadcast %cst_5 : f32 to vector<16x32xf32>
    %7 = arith.maximumf %5, %6 : vector<16x32xf32>
    %8 = arith.truncf %7 : vector<16x32xf32> to vector<16x32xbf16>
    %c0_6 = arith.constant 0 : index
    %c0_7 = arith.constant 0 : index
    %9 = vector.load %arg4[%c0_6, %c0_7] : memref<32x2xbf16, #tpu.memory_space<vmem>>, vector<32x2xbf16>
    %cst_8 = arith.constant dense<0.000000e+00> : vector<16x2xf32>
    %10 = tpu.matmul %8, %9, %cst_8 {dimension_numbers = #tpu.dot_dimension_numbers<[1], [0], [0], [1], [0, 0, 1, 1], [], []>} : vector<16x32xbf16>, vector<32x2xbf16>, vector<16x2xf32> -> vector<16x2xf32>
    %c0_9 = arith.constant 0 : index
    %c0_10 = arith.constant 0 : index
    %11 = vector.load %arg5[%c0_9, %c0_10] : memref<1x2xf32, #tpu.memory_space<vmem>>, vector<1x2xf32>
    %12 = vector.broadcast %11 : vector<1x2xf32> to vector<16x2xf32>
    %13 = arith.addf %10, %12 : vector<16x2xf32>
    %cst_11 = arith.constant dense<0xFF800000> : vector<16xf32>
    %14 = vector.multi_reduction <maximumf>, %13, %cst_11 [1] : vector<16x2xf32> to vector<16xf32>
    %15 = vector.shape_cast %14 : vector<16xf32> to vector<16x1xf32>
    %16 = vector.broadcast %15 : vector<16x1xf32> to vector<16x2xf32>
    %17 = arith.subf %13, %16 : vector<16x2xf32>
    %18 = math.exp %17 : vector<16x2xf32>
    %cst_12 = arith.constant dense<0.000000e+00> : vector<16xf32>
    %19 = vector.multi_reduction <add>, %18, %cst_12 [1] : vector<16x2xf32> to vector<16xf32>
    %20 = vector.shape_cast %19 : vector<16xf32> to vector<16x1xf32>
    %21 = vector.broadcast %20 : vector<16x1xf32> to vector<16x2xf32>
    %22 = arith.divf %18, %21 : vector<16x2xf32>
    %c0_13 = arith.constant 0 : index
    %c0_14 = arith.constant 0 : index
    %23 = vector.load %arg6[%c0_13, %c0_14] : memref<16x2xf32, #tpu.memory_space<vmem>>, vector<16x2xf32>
    tpu.vector_store %arg6[%c0_13, %c0_14], %22 {strides = array<i32>} : memref<16x2xf32, #tpu.memory_space<vmem>>, vector<16x2xf32>,
    return
  }
  func.func @transform_0(%arg0: i32) -> (i32, i32) {
    %c0_i32 = arith.constant 0 : i32
    %c0_i32_0 = arith.constant 0 : i32
    return %arg0, %c0_i32 : i32, i32
  }
  func.func @transform_1(%arg0: i32) -> (i32, i32) {
    %c0_i32 = arith.constant 0 : i32
    %c0_i32_0 = arith.constant 0 : i32
    %c0_i32_1 = arith.constant 0 : i32
    return %c0_i32, %c0_i32_0 : i32, i32
  }
  func.func @transform_2(%arg0: i32) -> (i32, i32) {
    %c0_i32 = arith.constant 0 : i32
    %c0_i32_0 = arith.constant 0 : i32
    %c0_i32_1 = arith.constant 0 : i32
    return %c0_i32, %c0_i32_0 : i32, i32
  }
  func.func @transform_3(%arg0: i32) -> (i32, i32) {
    %c0_i32 = arith.constant 0 : i32
    %c0_i32_0 = arith.constant 0 : i32
    %c0_i32_1 = arith.constant 0 : i32
    return %c0_i32, %c0_i32_0 : i32, i32
  }
  func.func @transform_4(%arg0: i32) -> (i32, i32) {
    %c0_i32 = arith.constant 0 : i32
    %c0_i32_0 = arith.constant 0 : i32
    %c0_i32_1 = arith.constant 0 : i32
    return %c0_i32, %c0_i32_0 : i32, i32
  }
  func.func @transform_5(%arg0: i32) -> (i32, i32) {
    %c0_i32 = arith.constant 0 : i32
    %c0_i32_0 = arith.constant 0 : i32
    return %arg0, %c0_i32 : i32, i32
  }
}

</mosaic_0001>

<bundles_post_ra>
// kernel: tpu_custom_call.1
= control target key start
LH: loop header
LB: loop body
LE: loop exit
PB: predicated region body
PF: predicated region fallthrough
CT: control target
= control target key end

     0   :  { %s543_s18 = smov 0   ;;  %s585_s0 = inlined_call_operand.vmem [shape: bf16[32,4], index: 0, kind: input, shape index: {}]   ;;  %s586_s1 = inlined_call_operand.vmem [shape: bf16[4,32], index: 1, kind: input, shape index: {}]   ;;  %s587_s2 = inlined_call_operand.vmem [shape: f32[1,32], index: 2, kind: input, shape index: {}]   ;;  %s588_s3 = inlined_call_operand.vmem [shape: bf16[32,2], index: 3, kind: input, shape index: {}]   ;;  %s589_s4 = inlined_call_operand.vmem [shape: f32[1,2], index: 4, kind: input, shape index: {}]   ;;  %s590_s5 = inlined_call_operand.vmem [shape: f32[32,2], index: 5, kind: output, shape index: {}]  }
   0x1 LB: > { %s445_s19 = sadd.s32 4294967295, %s509_s18   ;;  %p449_p0 = scmp.ge.s32.totalorder %s509_s18, 1  ;;  %s509_s18 = sphi %s543_s18, %s15_s18  }
   0x2   : > { %p188_p1 = scmp.lt.s32.totalorder %s509_s18, 3 }
   0x4   : > { %p189_p2 = pnand %p449_p0, %p188_p1 }
   0x5   : > { %s450_s22 = sshll.u32 (!%p189_p2), %s445_s19, 1 }
   0x6   : > { %192 = sbr.rel (%p189_p2) target bundleno = 731 (0x2db), region = 40  ;;  %p217_p3 = scmp.lt.s32.totalorder (!%p189_p2), %s450_s22, 3 }
   0xb   : > { %v231_v0 = vld [vmem:[%s586_s1] sm:$0x3]  ;;  %vm248_vm0 = vcmask 1041408   ;;  %v511_v1 = vmov 0.0   ;;  %vm512_vm1 = vmmov 0   ;;  %s592_s22 = smov (!%p217_p3, %s450_s22), 3 }
   0xc   : > { %468 = vmatprep.subr.bf16.mxu0 %v511_v1  ;;  %v250_v2 = vsel %vm248_vm0, %v231_v0, 0  ;;  %470 = vmatprep.mubr.msk.bf16.mxu0 %vm512_vm1, %v511_v1  ;;  %s451_s23 = sshll.u32 %s592_s22, 2  ;;  %vm244_vm2 = vcmask 31744   ;;  %v493_v4 = vld [vmem:[%s588_s3 + $0x8] sm:$0xff]   ;;  %v494_v5 = vld [vmem:[%s588_s3] sm:$0xff]   ;;  %vm319_vm3 = vcmask 261120  }
   0xd   : > { %469 = vmatpush3.bf16.msra.mxu0 %v250_v2  ;;  %474 = vmatprep.subr.bf16.mxu1 %v511_v1  ;;  %s220_s26 = scalar_lea.vmem %s585_s0, %s451_s23  ;;  %v454_v6 = vld [vmem:[%s587_s2] ss:$0 sm:$0xff]  ;;  %vm364_vm4 = vcmask 15360   ;;  %s453_s10 = sshll.u32 %s592_s22, 3 }
   0xe   : > { %478 = vmatprep.mubr.msk.bf16.mxu1 %vm512_vm1, %v511_v1  ;;  %v492_v3 = vld [vmem:[%s220_s26] sm:$0xff]   ;;  %475 = vmatpush3.bf16.msra.mxu1 %v493_v4  ;;  %s226_s13 = scalar_lea.vmem %s590_s5, %s453_s10 }
   0xf   : > { %476 = vmatprep.subr.bf16.mxu1 %v511_v1  ;;  %v457_v16 = vld [vmem:[%s589_s4] ss:$0 sm:$0xff] }
  0x10   : > { %471 = vmatmul.mubr.msk.bf16.vlgmr.msra.gmra.mxu0 %vm244_vm2, %v492_v3 }
  0x12   : > { %477 = vmatpush3.bf16.msra.mxu1 %v494_v5 }
  0xd0   : > { %v286_v7 = vpop.f32.mrf.mxu0 }
  0xd1   : > { %v287_v9 = vadd.f32 %v454_v6, %v286_v7 }
  0xd2   : > { %v472_v8 = vpop.f32.mrf.mxu0 }
  0xd3   : > { %v293_v13 = vmax.f32 %v287_v9, 0.0 }
  0xd4   : > { %v289_v10 = vpop.f32.mrf.mxu0 }
  0xd5   : > { %v290_v11 = vadd.f32 %v454_v6, %v289_v10 }
  0xd6   : > { %v473_v12 = vpop.f32.mrf.mxu0 }
  0xd7   : > { %v294_v14 = vmax.f32 %v290_v11, 0.0 }
  0xd9   : > { %v295_v15 = vpack.c.bf16 %v294_v14, %v293_v13 }
  0xdb   : > { %479 = vmatmul.mubr.msk.bf16.vlgmr.msra.gmra.mxu1 %vm319_vm3, %v295_v15 }
 0x19b   : > { %v357_v17 = vpop.f32.mrf.mxu1 }
 0x19c   : > { %v358_v18 = vadd.f32 %v457_v16, %v357_v17 }
 0x19d   : > { %v480_v19 = vpop.f32.mrf.mxu1 }
 0x19e   : > { %v365_v20 = vsel %vm364_vm4, %v358_v18, -inf }
 0x19f   : > { %366 = vmax.xlane.f32.xlu0 %v365_v20  ;;  %v360_v21 = vpop.f32.mrf.mxu1 }
 0x1a0   : > { %v361_v22 = vadd.f32 %v457_v16, %v360_v21 }
 0x1a1   : > { %v481_v23 = vpop.f32.mrf.mxu1 }
 0x1a2   : > { %v368_v24 = vsel %vm364_vm4, %v361_v22, -inf }
 0x1a3   : > { %369 = vmax.xlane.f32.xlu0 %v368_v24 }
 0x228   : > { %v367_v25 = vpop.xlane.xlu0 %366 }
 0x229   : > { %v371_v26 = vsub.f32 %v358_v18, %v367_v25 }
 0x22b   : > { %v373_v27 = vmul.f32 1.442695, %v371_v26 }
 0x22c   : > { %v370_v28 = vpop.xlane.xlu0 %369 }
 0x22d   : > { %495 = vpow2.f32 %v373_v27  ;;  %v372_v29 = vsub.f32 %v361_v22, %v370_v28 }
 0x22f   : > { %v375_v30 = vmul.f32 1.442695, %v372_v29 }
 0x231   : > { %497 = vpow2.f32 %v375_v30 }
 0x23a   : > { %v496_v31 = vpop.eup %495 }
 0x23b   : > { %v377_v32 = vsel %vm364_vm4, %v496_v31, 0.0 }
 0x23c   : > { %378 = vadd.xlane.f32.xlu1 %v377_v32 }
 0x23e   : > { %v498_v33 = vpop.eup %497 }
 0x23f   : > { %v380_v34 = vsel %vm364_vm4, %v498_v33, 0.0 }
 0x240   : > { %381 = vadd.xlane.f32.xlu1 %v380_v34 }
 0x2c5   : > { %v379_v35 = vpop.xlane.xlu1 %378 }
 0x2c6   : > { %499 = vrcp.f32 %v379_v35 }
 0x2c9   : > { %v382_v36 = vpop.xlane.xlu1 %381 }
 0x2ca   : > { %501 = vrcp.f32 %v382_v36 }
 0x2d3   : > { %v500_v37 = vpop.eup %499 }
 0x2d4   : > { %v384_v38 = vmul.f32 %v500_v37, %v496_v31 }
 0x2d6   : > { %387 = vst.msk [vmem:[%s226_s13] sm:$0xff] %vm364_vm4, %v384_v38 }
 0x2d7   : > { %v502_v39 = vpop.eup %501 }
 0x2d8   : > { %v386_v40 = vmul.f32 %v502_v39, %v498_v33 }
 0x2da   : > { %388 = vst.msk [vmem:[%s226_s13 + $0x8] sm:$0xff] %vm364_vm4, %v386_v40 }
 0x2db PF: > { %s15_s18 = sadd.s32 1, %s509_s18  }
 0x2dc   : > { %p12_p4 = scmp.ge.s32.totalorder %s15_s18, 4  }
 0x2de   :  { %14 = sbr.rel (!%p12_p4) target bundleno = 1 (0x1), region = 70 }

</bundles_post_ra>
